<compile_context>
chip_gen: v6e
topology: v6e:2x2x1
jax: 0.10.0
libtpu: 0.0.40
codegen_flags: <defaults>
</compile_context>

<pallas_src>
import jax
import jax.numpy as jnp
from jax.experimental import pallas as pl
from jax.experimental.pallas import tpu as pltpu


STATE_DIM = 3       # Pendulum-v0 observation_space.shape[0]
HIDDEN_DIM = 64
ACTION_DIM = 1      # Pendulum-v0 action_space.shape[0]
ACTION_BOUND = 2.0  # Pendulum-v0 action_space.high[0]


def _policy_kernel(x_ref, w1_ref, b1_ref, w2_ref, b2_ref, o_ref):
    # x_ref : (STATE_DIM, TB)      batch on lanes (lane-dense input tile)
    # w1_ref: (HIDDEN, STATE_DIM)  torch (out_features, in_features) layout, VMEM-resident
    # b1_ref: (HIDDEN, 1)          VMEM-resident
    # w2_ref: (HIDDEN, 1)          fc2 weight as a column, VMEM-resident
    # b2_ref: (1, 1) in SMEM       scalar fc2 bias
    # o_ref : (1, TB)              batch on lanes (lane-dense output store)
    x = x_ref[...]
    w1 = w1_ref[...]

    # fc1 as three VPU broadcast-FMAs (a K=3 MXU contraction would waste >97% of the array).
    h = (w1[:, 0:1] * x[0:1, :]
         + w1[:, 1:2] * x[1:2, :]
         + w1[:, 2:3] * x[2:3, :]
         + b1_ref[...])
    h = jnp.maximum(h, 0.0)                                    # ReLU (VPU)

    # fc2 (N=1) as elementwise multiply + sublane reduction (VPU + XLU; no MXU fill/drain).
    y = jnp.sum(h * w2_ref[...], axis=0, keepdims=True) + b2_ref[0, 0]

    # tanh on the EUP; the output row is lane-dense (batch on lanes).
    o_ref[...] = (jnp.tanh(y) * ACTION_BOUND).astype(o_ref.dtype)


def policy_net_forward(x, w1, b1, w2, b2, *, block_b=512):
    """PolicyNet forward pass.

    x : (B, STATE_DIM) float32
    w1: (HIDDEN_DIM, STATE_DIM), b1: (HIDDEN_DIM,)    -- torch nn.Linear layout
    w2: (ACTION_DIM, HIDDEN_DIM), b2: (ACTION_DIM,)
    Returns (B, ACTION_DIM) float32.
    """
    batch = x.shape[0]

    # Batch tile: multiple of 128 so the (1, TB) output block is lane-dense and
    # the (STATE_DIM, TB) input block satisfies the lane-divisibility rule.
    tb = block_b if batch >= block_b else max(128, ((batch + 127) // 128) * 128)
    b_pad = ((batch + tb - 1) // tb) * tb
    grid = (b_pad // tb,)

    # Wrapper-side layout plumbing: batch on the lane axis for both input and output.
    x_t = jnp.pad(x, ((0, b_pad - batch), (0, 0))).T            # (STATE_DIM, b_pad)
    b1_c = b1.reshape(HIDDEN_DIM, 1)                            # (HIDDEN, 1)
    w2_c = w2.reshape(ACTION_DIM, HIDDEN_DIM).T                 # (HIDDEN, 1)
    b2_s = b2.reshape(1, 1)                                     # scalar -> SMEM

    out_t = pl.pallas_call(
        _policy_kernel,
        out_shape=jax.ShapeDtypeStruct((ACTION_DIM, b_pad), jnp.float32),
        grid=grid,
        in_specs=[
            pl.BlockSpec((STATE_DIM, tb), lambda i: (0, i)),          # pipelined x tile
            pl.BlockSpec((HIDDEN_DIM, STATE_DIM), lambda i: (0, 0)),  # resident w1
            pl.BlockSpec((HIDDEN_DIM, 1), lambda i: (0, 0)),          # resident b1
            pl.BlockSpec((HIDDEN_DIM, 1), lambda i: (0, 0)),          # resident w2
            pl.BlockSpec(memory_space=pltpu.MemorySpace.SMEM),        # scalar b2
        ],
        out_specs=pl.BlockSpec((ACTION_DIM, tb), lambda i: (0, i)),
        compiler_params=pltpu.CompilerParams(
            dimension_semantics=("parallel",)),   # lets v7x shard the batch across 2 TCs
    )(x_t, w1, b1_c, w2_c, b2_s)

    return out_t[0, :batch].reshape(batch, ACTION_DIM)


def _init_params(key):
    """Deterministic init mimicking torch.nn.Linear defaults (uniform +/- 1/sqrt(fan_in)),
    weights kept in torch (out_features, in_features) layout."""
    k1, k2, k3, k4 = jax.random.split(key, 4)
    lim1 = 1.0 / jnp.sqrt(STATE_DIM)
    lim2 = 1.0 / jnp.sqrt(HIDDEN_DIM)
    w1 = jax.random.uniform(k1, (HIDDEN_DIM, STATE_DIM), jnp.float32, -lim1, lim1)
    b1 = jax.random.uniform(k2, (HIDDEN_DIM,), jnp.float32, -lim1, lim1)
    w2 = jax.random.uniform(k3, (ACTION_DIM, HIDDEN_DIM), jnp.float32, -lim2, lim2)
    b2 = jax.random.uniform(k4, (ACTION_DIM,), jnp.float32, -lim2, lim2)
    return w1, b1, w2, b2


def _reference(x, w1, b1, w2, b2):
    h = jnp.maximum(x @ w1.T + b1, 0.0)
    return jnp.tanh(h @ w2.T + b2) * ACTION_BOUND


if __name__ == "__main__":
    key = jax.random.PRNGKey(0)
    kx, kp = jax.random.split(key)

    batch = 8
    x = jax.random.normal(kx, (batch, STATE_DIM), jnp.float32)
    w1, b1, w2, b2 = _init_params(kp)

    out = jax.block_until_ready(policy_net_forward(x, w1, b1, w2, b2))
    ref = _reference(x, w1, b1, w2, b2)

    assert out.shape == (batch, ACTION_DIM), out.shape
    assert jnp.allclose(out, ref, atol=1e-5, rtol=1e-5), (out, ref)

    print("KERNEL_OK")
</pallas_src>

<mosaic_0001>
module attributes {stable_mosaic.version = 11 : i64} {
  func.func @_policy_kernel(%arg0: i32, %arg1: memref<3x128xf32, #tpu.memory_space<vmem>>, %arg2: memref<64x3xf32, #tpu.memory_space<vmem>>, %arg3: memref<64x1xf32, #tpu.memory_space<vmem>>, %arg4: memref<64x1xf32, #tpu.memory_space<vmem>>, %arg5: memref<1x1xf32, #tpu.memory_space<smem>>, %arg6: memref<1x128xf32, #tpu.memory_space<vmem>>) attributes {dimension_semantics = [#tpu.dimension_semantics<parallel>], iteration_bounds = array<i64: 1>, scalar_prefetch = 0 : i64, scratch_operands = 0 : i64, tpu.core_type = #tpu.core_type<tc>, window_params = [{transform_indices = @transform_0, window_bounds = array<i64: 3, 128>}, {pipeline_mode = #tpu.pipeline_mode<synchronous>, transform_indices = @transform_1, window_bounds = array<i64: 64, 3>}, {pipeline_mode = #tpu.pipeline_mode<synchronous>, transform_indices = @transform_2, window_bounds = array<i64: 64, 1>}, {pipeline_mode = #tpu.pipeline_mode<synchronous>, transform_indices = @transform_3, window_bounds = array<i64: 64, 1>}, {transform_indices = @transform_4, window_bounds = array<i64: 1, 1>}, {transform_indices = @transform_5, window_bounds = array<i64: 1, 128>}]} {
    %c0 = arith.constant 0 : index
    %c0_0 = arith.constant 0 : index
    %0 = vector.load %arg1[%c0, %c0_0] : memref<3x128xf32, #tpu.memory_space<vmem>>, vector<3x128xf32>
    %c0_1 = arith.constant 0 : index
    %c0_2 = arith.constant 0 : index
    %1 = vector.load %arg2[%c0_1, %c0_2] : memref<64x3xf32, #tpu.memory_space<vmem>>, vector<64x3xf32>
    %2 = vector.extract_strided_slice %1 {offsets = [0, 0], sizes = [64, 1], strides = [1, 1]} : vector<64x3xf32> to vector<64x1xf32>
    %3 = vector.extract_strided_slice %0 {offsets = [0, 0], sizes = [1, 128], strides = [1, 1]} : vector<3x128xf32> to vector<1x128xf32>
    %4 = vector.broadcast %2 : vector<64x1xf32> to vector<64x128xf32>
    %5 = vector.broadcast %3 : vector<1x128xf32> to vector<64x128xf32>
    %6 = arith.mulf %4, %5 : vector<64x128xf32>
    %7 = vector.extract_strided_slice %1 {offsets = [0, 1], sizes = [64, 1], strides = [1, 1]} : vector<64x3xf32> to vector<64x1xf32>
    %8 = vector.extract_strided_slice %0 {offsets = [1, 0], sizes = [1, 128], strides = [1, 1]} : vector<3x128xf32> to vector<1x128xf32>
    %9 = vector.broadcast %7 : vector<64x1xf32> to vector<64x128xf32>
    %10 = vector.broadcast %8 : vector<1x128xf32> to vector<64x128xf32>
    %11 = arith.mulf %9, %10 : vector<64x128xf32>
    %12 = arith.addf %6, %11 : vector<64x128xf32>
    %13 = vector.extract_strided_slice %1 {offsets = [0, 2], sizes = [64, 1], strides = [1, 1]} : vector<64x3xf32> to vector<64x1xf32>
    %14 = vector.extract_strided_slice %0 {offsets = [2, 0], sizes = [1, 128], strides = [1, 1]} : vector<3x128xf32> to vector<1x128xf32>
    %15 = vector.broadcast %13 : vector<64x1xf32> to vector<64x128xf32>
    %16 = vector.broadcast %14 : vector<1x128xf32> to vector<64x128xf32>
    %17 = arith.mulf %15, %16 : vector<64x128xf32>
    %18 = arith.addf %12, %17 : vector<64x128xf32>
    %c0_3 = arith.constant 0 : index
    %c0_4 = arith.constant 0 : index
    %19 = vector.load %arg3[%c0_3, %c0_4] : memref<64x1xf32, #tpu.memory_space<vmem>>, vector<64x1xf32>
    %20 = vector.broadcast %19 : vector<64x1xf32> to vector<64x128xf32>
    %21 = arith.addf %18, %20 : vector<64x128xf32>
    %cst = arith.constant 0.000000e+00 : f32
    %22 = vector.broadcast %cst : f32 to vector<64x128xf32>
    %23 = arith.maximumf %21, %22 : vector<64x128xf32>
    %c0_5 = arith.constant 0 : index
    %c0_6 = arith.constant 0 : index
    %24 = vector.load %arg4[%c0_5, %c0_6] : memref<64x1xf32, #tpu.memory_space<vmem>>, vector<64x1xf32>
    %25 = vector.broadcast %24 : vector<64x1xf32> to vector<64x128xf32>
    %26 = arith.mulf %23, %25 : vector<64x128xf32>
    %cst_7 = arith.constant dense<0.000000e+00> : vector<128xf32>
    %27 = vector.multi_reduction <add>, %26, %cst_7 [0] : vector<64x128xf32> to vector<128xf32>
    %28 = vector.shape_cast %27 : vector<128xf32> to vector<1x128xf32>
    %c0_8 = arith.constant 0 : index
    %c0_9 = arith.constant 0 : index
    %29 = memref.load %arg5[%c0_8, %c0_9] : memref<1x1xf32, #tpu.memory_space<smem>>
    %30 = vector.broadcast %29 : f32 to vector<1x128xf32>
    %31 = arith.addf %28, %30 : vector<1x128xf32>
    %32 = math.tanh %31 : vector<1x128xf32>
    %cst_10 = arith.constant 2.000000e+00 : f32
    %33 = vector.broadcast %cst_10 : f32 to vector<1x128xf32>
    %34 = arith.mulf %32, %33 : vector<1x128xf32>
    %c0_11 = arith.constant 0 : index
    %c0_12 = arith.constant 0 : index
    %35 = vector.load %arg6[%c0_11, %c0_12] : memref<1x128xf32, #tpu.memory_space<vmem>>, vector<1x128xf32>
    tpu.vector_store %arg6[%c0_11, %c0_12], %34 {strides = array<i32>} : memref<1x128xf32, #tpu.memory_space<vmem>>, vector<1x128xf32>,
    return
  }
  func.func @transform_0(%arg0: i32) -> (i32, i32) {
    %c0_i32 = arith.constant 0 : i32
    %c0_i32_0 = arith.constant 0 : i32
    return %c0_i32, %arg0 : i32, i32
  }
  func.func @transform_1(%arg0: i32) -> (i32, i32) {
    %c0_i32 = arith.constant 0 : i32
    %c0_i32_0 = arith.constant 0 : i32
    %c0_i32_1 = arith.constant 0 : i32
    return %c0_i32, %c0_i32_0 : i32, i32
  }
  func.func @transform_2(%arg0: i32) -> (i32, i32) {
    %c0_i32 = arith.constant 0 : i32
    %c0_i32_0 = arith.constant 0 : i32
    %c0_i32_1 = arith.constant 0 : i32
    return %c0_i32, %c0_i32_0 : i32, i32
  }
  func.func @transform_3(%arg0: i32) -> (i32, i32) {
    %c0_i32 = arith.constant 0 : i32
    %c0_i32_0 = arith.constant 0 : i32
    %c0_i32_1 = arith.constant 0 : i32
    return %c0_i32, %c0_i32_0 : i32, i32
  }
  func.func @transform_4(%arg0: i32) -> (i32, i32) {
    %c0_i32 = arith.constant 0 : i32
    %c0_i32_0 = arith.constant 0 : i32
    %c0_i32_1 = arith.constant 0 : i32
    return %c0_i32, %c0_i32_0 : i32, i32
  }
  func.func @transform_5(%arg0: i32) -> (i32, i32) {
    %c0_i32 = arith.constant 0 : i32
    %c0_i32_0 = arith.constant 0 : i32
    return %c0_i32, %arg0 : i32, i32
  }
}

</mosaic_0001>

<bundles_post_ra>
// kernel: tpu_custom_call.1
= control target key start
LH: loop header
LB: loop body
LE: loop exit
PB: predicated region body
PF: predicated region fallthrough
CT: control target
= control target key end

     0   :  { %v383_v2 = vmov 1   ;;  %v384_v3 = vmov 0   ;;  %v385_v5 = vmov 2   ;;  %s538_s0 = inlined_call_operand.vmem [shape: f32[3,128], index: 0, kind: input, shape index: {}]   ;;  %s539_s1 = inlined_call_operand.vmem [shape: f32[64,3], index: 1, kind: input, shape index: {}]   ;;  %s540_s2 = inlined_call_operand.vmem [shape: f32[64,1], index: 2, kind: input, shape index: {}]   ;;  %s541_s3 = inlined_call_operand.vmem [shape: f32[64,1], index: 3, kind: input, shape index: {}]   ;;  %s542_s4 = inlined_call_operand.<no memory space> [shape: f32[1,1], index: 4, kind: input, shape index: {}]   ;;  %s543_s5 = inlined_call_operand.hbm [shape: f32[1,128], index: 5, kind: output, shape index: {}]  }
   0x1   :  { %v25_v0 = vld [vmem:[%s539_s1 + $0x10] sm:$0xff]  ;;  %v23_v1 = vld [vmem:[%s539_s1] sm:$0xff]  ;;  %345 = vset.pattern.permute.xlu0 %v383_v2  ;;  %344 = vset.pattern.permute.xlu1 %v384_v3  ;;  %v26_v4 = vld [vmem:[%s539_s1 + $0x18] sm:$0xff] }
   0x2   :  { %43 = vperm.xlu1 %344, %v25_v0   ;;  %84 = vperm.xlu0 %345, %v23_v1   ;;  %v28_v6 = vld [vmem:[%s539_s1 + $0x28] sm:$0xff] }
   0x6   :  { %48 = vperm.xlu1 %344, %v26_v4   ;;  %347 = vset.pattern.permute.xlu0 %v385_v5 }
   0x7   :  { %136 = vperm.xlu0 %347, %v23_v1  }
   0x8   :  { %11 = vsyncpa [#allocation4], 0  ;;  %v30_v7 = vld [vmem:[%s539_s1 + $0x38] sm:$0xff]  ;;  %v24_v8 = vld [vmem:[%s539_s1 + $0x8] sm:$0xff]  ;;  %v71_v46 = vlaneseq  ;;  %s386_s15 = smov [#allocation3]  }
   0x9   :  { %v27_v9 = vld [vmem:[%s539_s1 + $0x20] sm:$0xff]  ;;  %v29_v10 = vld [vmem:[%s539_s1 + $0x30] sm:$0xff]  ;;  %v188_v12 = vld [vmem:[%s540_s2 + $0x8] sm:$0xff]  ;;  %s332_s16 = sshll.u32 %s386_s15, 4  ;;  %s333_s16 = int_to_ptr.vmem [resolvable:$true] %s332_s16 }
   0xa   :  { %58 = vperm.xlu1 %344, %v28_v6   ;;  %v187_v11 = vld [vmem:[%s540_s2] sm:$0xff]  ;;  %v189_v13 = vld [vmem:[%s540_s2 + $0x10] sm:$0xff]  ;;  %v252_v14 = vld [vmem:[%s541_s3 + $0x8] sm:$0xff]  ;;  %v72_v49 = vshrl.u32 %v71_v46, 7  ;;  %s361_s17 = scalar_lea.vmem %s333_s16, 16  ;;  %s365_s18 = scalar_lea.vmem %s333_s16, 32 }
   0xb   :  { %144 = vperm.xlu0 %347, %v25_v0   ;;  %v191_v15 = vld [vmem:[%s540_s2 + $0x20] sm:$0xff]  ;;  %v193_v16 = vld [vmem:[%s540_s2 + $0x30] sm:$0xff]  ;;  %v190_v17 = vld [vmem:[%s540_s2 + $0x18] sm:$0xff]  ;;  %p362_p0 = scmp.ne.s32.totalorder %s333_s16, %s361_s17  ;;  %p366_p1 = scmp.lt.s32.totalorder %s333_s16, %s333_s16 }
   0xc   :  { %v256_v18 = vld [vmem:[%s541_s3 + $0x28] sm:$0xff]  ;;  %v251_v19 = vld [vmem:[%s541_s3] sm:$0xff]  ;;  %v258_v20 = vld [vmem:[%s541_s3 + $0x38] sm:$0xff]  ;;  %v73_v52 = vsub.s32 0, %v72_v49  ;;  %v117_v53 = vsub.s32 1, %v72_v49  ;;  %v169_v58 = vsub.s32 2, %v72_v49  ;;  %p367_p2 = scmp.lt.s32.totalorder %s365_s18, %s361_s17 }
   0xd   :  { %v253_v21 = vld [vmem:[%s541_s3 + $0x10] sm:$0xff]  ;;  %v192_v22 = vld [vmem:[%s540_s2 + $0x28] sm:$0xff]  ;;  %v254_v23 = vld [vmem:[%s541_s3 + $0x18] sm:$0xff] }
   0xe   :  { %68 = vperm.xlu1 %344, %v30_v7   ;;  %v255_v24 = vld [vmem:[%s541_s3 + $0x20] sm:$0xff]  ;;  %v194_v25 = vld [vmem:[%s540_s2 + $0x38] sm:$0xff]  ;;  %v257_v26 = vld [vmem:[%s541_s3 + $0x30] sm:$0xff]  ;;  %p368_p3 = por %p367_p2, %p366_p1 }
   0xf   :  { %148 = vperm.xlu0 %347, %v26_v4   ;;  %v22_v54 = vld [vmem:[%s538_s0] sm:$0x7] }
  0x10   :  { %v509_v56 = vrot.slane %v22_v54, %v73_v52  ;;  %v118_v57 = vrot.slane %v22_v54, %v117_v53  ;;  %v512_v63 = vrot.slane %v22_v54, %v169_v58  ;;  %p369_p4 = pnand %p368_p3, %p362_p0 }
  0x12   :  { %346 = vset.pattern.permute.xlu1 %v383_v2 }
  0x13   :  { %88 = vperm.xlu1 %346, %v24_v8   ;;  %156 = vperm.xlu0 %347, %v28_v6  }
  0x17   :  { %92 = vperm.xlu1 %346, %v25_v0   ;;  %164 = vperm.xlu0 %347, %v30_v7  }
  0x1b   :  { %348 = vset.pattern.permute.xlu1 %v385_v5  ;;  %358 = vset.pattern.permute.xlu0 %v384_v3 }
  0x1c   :  { %140 = vperm.xlu1 %348, %v24_v8   ;;  %33 = vperm.xlu0 %358, %v23_v1  }
  0x20   :  { %349 = vset.pattern.permute.xlu1 %v383_v2  ;;  %38 = vperm.xlu0 %358, %v24_v8  }
  0x21   :  { %96 = vperm.xlu1 %349, %v26_v4  }
  0x24   :  { %53 = vperm.xlu0 %358, %v27_v9  }
  0x25   :  { %100 = vperm.xlu1 %349, %v27_v9  }
  0x28   :  { %63 = vperm.xlu0 %358, %v29_v10  }
  0x29   :  { %350 = vset.pattern.permute.xlu1 %v384_v3 }
  0x2a   :  { %197 = vperm.xlu1 %350, %v187_v11  }
  0x2c   :  { %202 = vperm.xlu0 %358, %v188_v12  }
  0x2e   :  { %351 = vset.pattern.permute.xlu1 %v383_v2 }
  0x2f   :  { %104 = vperm.xlu1 %351, %v28_v6  }
  0x30   :  { %207 = vperm.xlu0 %358, %v189_v13  }
  0x33   :  { %352 = vset.pattern.permute.xlu1 %v385_v5 }
  0x34   :  { %152 = vperm.xlu1 %352, %v27_v9   ;;  %266 = vperm.xlu0 %358, %v252_v14  }
  0x38   :  { %353 = vset.pattern.permute.xlu1 %v383_v2  ;;  %217 = vperm.xlu0 %358, %v191_v15  }
  0x39   :  { %108 = vperm.xlu1 %353, %v29_v10  }
  0x3c   :  { %227 = vperm.xlu0 %358, %v193_v16  }
  0x3d   :  { %354 = vset.pattern.permute.xlu1 %v384_v3 }
  0x3e   :  { %212 = vperm.xlu1 %354, %v190_v17  }
  0x40   :  { %286 = vperm.xlu0 %358, %v256_v18  }
  0x42   :  { %261 = vperm.xlu1 %354, %v251_v19  }
  0x44   :  { %296 = vperm.xlu0 %358, %v258_v20  }
  0x46   :  { %355 = vset.pattern.permute.xlu1 %v383_v2 }
  0x47   :  { %112 = vperm.xlu1 %355, %v30_v7  }
  0x4b   :  { %356 = vset.pattern.permute.xlu1 %v385_v5 }
  0x4c   :  { %160 = vperm.xlu1 %356, %v29_v10  }
  0x50   :  { %357 = vset.pattern.permute.xlu1 %v384_v3 }
  0x51   :  { %271 = vperm.xlu1 %357, %v253_v21  }
  0x55   :  { %222 = vperm.xlu1 %357, %v192_v22  }
  0x59   :  { %276 = vperm.xlu1 %357, %v254_v23  }
  0x5d   :  { %281 = vperm.xlu1 %357, %v255_v24  }
  0x61   :  { %232 = vperm.xlu1 %357, %v194_v25  }
  0x65   :  { %291 = vperm.xlu1 %357, %v257_v26  }
  0x7d   :  { %v44_v27 = vpop.permute.xlu1 %43  ;;  %v85_v28 = vpop.permute.xlu0 %84 }
  0x7e   :  { %v119_v60 = vmul.f32 %v118_v57, %v85_v28  ;;  %v77_v6 = vmul.f32 %v509_v56, %v44_v27 }
  0x81   :  { %v49_v29 = vpop.permute.xlu1 %48 }
  0x82   :  { %v137_v31 = vpop.permute.xlu0 %136  ;;  %v78_v13 = vmul.f32 %v509_v56, %v49_v29 }
  0x83   :  { %v171_v0 = vmul.f32 %v512_v63, %v137_v31 }
  0x85   :  { %v59_v30 = vpop.permute.xlu1 %58 }
  0x86   :  { %v145_v33 = vpop.permute.xlu0 %144  ;;  %v80_v26 = vmul.f32 %v509_v56, %v59_v30 }
  0x87   :  { %v173_v9 = vmul.f32 %v512_v63, %v145_v33 }
  0x89   :  { %v500_v32 = vpop.permute.xlu1 %68 }
  0x8a   :  { %v149_v35 = vpop.permute.xlu0 %148 }
  0x8b   :  { %v174_v16 = vmul.f32 %v512_v63, %v149_v35 }
  0x8e   :  { %v89_v34 = vpop.permute.xlu1 %88  ;;  %v502_v38 = vpop.permute.xlu0 %156 }
  0x8f   :  { %v120_v7 = vmul.f32 %v118_v57, %v89_v34 }
  0x92   :  { %v93_v36 = vpop.permute.xlu1 %92  ;;  %v504_v40 = vpop.permute.xlu0 %164 }
  0x93   :  { %v121_v1 = vmul.f32 %v118_v57, %v93_v36 }
  0x95   :  { %v129_v10 = vadd.f32 %v121_v1, %v77_v6 }
  0x97   :  { %v141_v37 = vpop.permute.xlu1 %140  ;;  %v34_v42 = vpop.permute.xlu0 %33  ;;  %v181_v24 = vadd.f32 %v173_v9, %v129_v10 }
  0x98   :  { %v75_v61 = vmul.f32 %v509_v56, %v34_v42  ;;  %v172_v14 = vmul.f32 %v512_v63, %v141_v37 }
  0x9a   :  { %v127_v2 = vadd.f32 %v119_v60, %v75_v61 }
  0x9b   :  { %v39_v44 = vpop.permute.xlu0 %38 }
  0x9c   :  { %v97_v39 = vpop.permute.xlu1 %96  ;;  %v76_v3 = vmul.f32 %v509_v56, %v39_v44  ;;  %v179_v12 = vadd.f32 %v171_v0, %v127_v2 }
  0x9d   :  { %v122_v8 = vmul.f32 %v118_v57, %v97_v39 }
  0x9e   :  { %v128_v11 = vadd.f32 %v120_v7, %v76_v3 }
  0x9f   :  { %v54_v48 = vpop.permute.xlu0 %53  ;;  %v130_v17 = vadd.f32 %v122_v8, %v78_v13 }
  0xa0   :  { %v101_v41 = vpop.permute.xlu1 %100  ;;  %v79_v18 = vmul.f32 %v509_v56, %v54_v48  ;;  %v180_v22 = vadd.f32 %v172_v14, %v128_v11 }
  0xa1   :  { %v123_v19 = vmul.f32 %v118_v57, %v101_v41  ;;  %v182_v31 = vadd.f32 %v174_v16, %v130_v17  ;;  %v176_v41 = vmul.f32 %v512_v63, %v502_v38  ;;  %v82_v38 = vmul.f32 %v509_v56, %v500_v32 }
  0xa3   :  { %v64_v51 = vpop.permute.xlu0 %63  ;;  %v131_v29 = vadd.f32 %v123_v19, %v79_v18 }
  0xa5   :  { %v198_v43 = vpop.permute.xlu1 %197 }
  0xa6   :  { %v235_v21 = vadd.f32 %v198_v43, %v179_v12 }
  0xa7   :  { %v203_v59 = vpop.permute.xlu0 %202 }
  0xa8   :  { %v236_v27 = vadd.f32 %v203_v59, %v180_v22  ;;  %v243_v34 = vmax.f32 %v235_v21, 0.0 }
  0xaa   :  { %v105_v45 = vpop.permute.xlu1 %104  ;;  %v244_v42 = vmax.f32 %v236_v27, 0.0 }
  0xab   :  { %v208_v4 = vpop.permute.xlu0 %207  ;;  %v124_v23 = vmul.f32 %v118_v57, %v105_v45  ;;  %v81_v45 = vmul.f32 %v509_v56, %v64_v51 }
  0xac   :  { %v237_v28 = vadd.f32 %v208_v4, %v181_v24  ;;  %v321_v24 = vstv %s542_s4 }
  0xad   :  { %v132_v35 = vadd.f32 %v124_v23, %v80_v26 }
  0xae   :  { %v245_v43 = vmax.f32 %v237_v28, 0.0 }
  0xaf   :  { %v153_v47 = vpop.permute.xlu1 %152  ;;  %v267_v20 = vpop.permute.xlu0 %266  ;;  %v184_v49 = vadd.f32 %v176_v41, %v132_v35 }
  0xb0   :  { %v175_v25 = vmul.f32 %v512_v63, %v153_v47  ;;  %v300_v30 = vmul.f32 %v267_v20, %v244_v42 }
  0xb2   :  { %v183_v37 = vadd.f32 %v175_v25, %v131_v29 }
  0xb3   :  { %v218_v36 = vpop.permute.xlu0 %217 }
  0xb4   :  { %v109_v50 = vpop.permute.xlu1 %108  ;;  %v239_v52 = vadd.f32 %v218_v36, %v183_v37 }
  0xb5   :  { %v125_v47 = vmul.f32 %v118_v57, %v109_v50 }
  0xb6   :  { %v247_v1 = vmax.f32 %v239_v52, 0.0 }
  0xb7   :  { %v228_v60 = vpop.permute.xlu0 %227 }
  0xb9   :  { %v213_v55 = vpop.permute.xlu1 %212 }
  0xba   :  { %v238_v39 = vadd.f32 %v213_v55, %v182_v31 }
  0xbb   :  { %v287_v7 = vpop.permute.xlu0 %286 }
  0xbc   :  { %v246_v53 = vmax.f32 %v238_v39, 0.0 }
  0xbd   :  { %v262_v62 = vpop.permute.xlu1 %261 }
  0xbe   :  { %v299_v44 = vmul.f32 %v262_v62, %v243_v34  ;;  %v133_v62 = vadd.f32 %v125_v47, %v81_v45 }
  0xbf   :  { %v297_v17 = vpop.permute.xlu0 %296 }
  0xc0   :  { %v307_v54 = vadd.f32 %v300_v30, %v299_v44 }
  0xc2   :  { %v113_v5 = vpop.permute.xlu1 %112 }
  0xc3   :  { %v126_v58 = vmul.f32 %v118_v57, %v113_v5  ;;  %v178_v57 = vmul.f32 %v512_v63, %v504_v40 }
  0xc5   :  { %v134_v2 = vadd.f32 %v126_v58, %v82_v38 }
  0xc7   :  { %v161_v15 = vpop.permute.xlu1 %160  ;;  %v186_v10 = vadd.f32 %v178_v57, %v134_v2 }
  0xc8   :  { %v177_v59 = vmul.f32 %v512_v63, %v161_v15 }
  0xca   :  { %v185_v50 = vadd.f32 %v177_v59, %v133_v62 }
  0xcc   :  { %v272_v33 = vpop.permute.xlu1 %271  ;;  %v241_v11 = vadd.f32 %v228_v60, %v185_v50 }
  0xcd   :  { %v301_v48 = vmul.f32 %v272_v33, %v245_v43 }
  0xce   :  { %v249_v14 = vmax.f32 %v241_v11, 0.0 }
  0xcf   :  { %v308_v0 = vadd.f32 %v307_v54, %v301_v48 }
  0xd0   :  { %v223_v46 = vpop.permute.xlu1 %222 }
  0xd1   :  { %v240_v55 = vadd.f32 %v223_v46, %v184_v49 }
  0xd3   :  { %v248_v3 = vmax.f32 %v240_v55, 0.0 }
  0xd4   :  { %v277_v61 = vpop.permute.xlu1 %276 }
  0xd5   :  { %v302_v51 = vmul.f32 %v277_v61, %v246_v53  ;;  %v304_v8 = vmul.f32 %v287_v7, %v248_v3 }
  0xd7   :  { %v309_v4 = vadd.f32 %v308_v0, %v302_v51 }
  0xd8   :  { %v282_v6 = vpop.permute.xlu1 %281 }
  0xd9   :  { %v303_v5 = vmul.f32 %v282_v6, %v247_v1 }
  0xdb   :  { %v310_v9 = vadd.f32 %v309_v4, %v303_v5 }
  0xdc   :  { %v233_v12 = vpop.permute.xlu1 %232 }
  0xdd   :  { %v242_v32 = vadd.f32 %v233_v12, %v186_v10  ;;  %v311_v56 = vadd.f32 %v310_v9, %v304_v8 }
  0xdf   :  { %v250_v13 = vmax.f32 %v242_v32, 0.0 }
  0xe0   :  { %v292_v15 = vpop.permute.xlu1 %291 }
  0xe1   :  { %v305_v16 = vmul.f32 %v292_v15, %v249_v14  ;;  %v306_v18 = vmul.f32 %v297_v17, %v250_v13 }
  0xe3   :  { %v312_v19 = vadd.f32 %v311_v56, %v305_v16 }
  0xe5   :  { %v313_v20 = vadd.f32 %v312_v19, %v306_v18 }
  0xe7   :  { %v314_v21 = vrot.slane %v313_v20, 4 }
  0xe9   :  { %v315_v22 = vadd.f32 %v314_v21, %v313_v20 }
  0xeb   :  { %v316_v40 = vrot.slane %v315_v22, 2 }
  0xed   :  { %v317_v63 = vadd.f32 %v316_v40, %v315_v22 }
  0xef   :  { %v318_v23 = vrot.slane %v317_v63, 1 }
  0xf1   :  { %v319_v25 = vadd.f32 %v318_v23, %v317_v63 }
  0xf3   :  { %v322_v26 = vadd.f32 %v321_v24, %v319_v25 }
  0xf5   :  { %359 = vtanh.f32 %v322_v26 }
 0x102   :  { %v360_v27 = vpop.eup %359 }
 0x103   :  { %v324_v28 = vmul.f32 2.0, %v360_v27 }
 0x105   :  { %325 = vst [vmem:[#allocation3] sm:$0x1] %v324_v28 }
 0x106   :  { %372 = shalt.err (!%p369_p4)
}
 0x107   :  { %335 = dma.vmem_to_hbm [thread:$0]  %s333_s16, 16, %s543_s5, [#allocation4]  }
 0x108   :  { %381 = dma.done.wait [#allocation4], 16  }
 0x109   :  { %382 = vsyncadd [#allocation4], 4294967280 }
 0x10a   :  { %339 = vsyncpa [#allocation4], 1 }

</bundles_post_ra>
